<compile_context>
chip_gen: v6e
topology: v6e:2x2x1
jax: 0.10.0
libtpu: 0.0.40
codegen_flags: <defaults>
</compile_context>

<pallas_src>
import functools

import jax
import jax.numpy as jnp
from jax import lax
from jax.experimental import pallas as pl
from jax.experimental.pallas import tpu as pltpu

EPS = 1e-12      # torch.nn.functional.normalize default eps
D_L = 5          # lfeats feature dim
D_D = 25         # dif_lfeats feature dim
K_PAD = 32       # 30 features + 1 bias column + 1 zero pad


def _round_up(x, m):
    return ((x + m - 1) // m) * m


def location_encoder_kernel(x_ref, w_ref, out_ref):
    # x_ref: (bb, 32)  [0:5]=lfeats  [5:30]=dif_lfeats  [30]=1.0  [31]=0.0
    # w_ref: (32, Jp)  rows 0:30 = fc weight, row 30 = fc bias, row 31 = 0
    # out_ref: (bb, Jp)
    x = x_ref[...]
    lane = lax.broadcasted_iota(jnp.int32, x.shape, 1)
    m_l = lane < D_L
    m_d = jnp.logical_and(lane >= D_L, lane < D_L + D_D)

    xx = x * x
    ss_l = jnp.sum(jnp.where(m_l, xx, 0.0), axis=-1, keepdims=True)   # (bb, 1)
    ss_d = jnp.sum(jnp.where(m_d, xx, 0.0), axis=-1, keepdims=True)   # (bb, 1)
    # F.normalize: x / max(||x||, eps) == x * rsqrt(max(ss, eps^2))
    s_l = lax.rsqrt(jnp.maximum(ss_l, EPS * EPS))
    s_d = lax.rsqrt(jnp.maximum(ss_d, EPS * EPS))
    scale = jnp.where(m_l, s_l, jnp.where(m_d, s_d, 1.0))             # 1.0 on bias/pad cols
    x_n = x * scale

    out_ref[...] = jnp.dot(x_n, w_ref[...], preferred_element_type=jnp.float32)


@functools.partial(jax.jit, static_argnames=("block_b",))
def location_encoder_forward(lfeats, dif_lfeats, params, block_b=1024):
    """lfeats: (B, 5) f32; dif_lfeats: (B, 25) f32.

    params: {'W': (30, J) f32 (== torch fc.weight.T), 'b': (J,) f32}.
    Returns (B, J) f32.
    """
    B = lfeats.shape[0]
    W, b = params['W'], params['b']
    J = W.shape[1]
    J_pad = _round_up(J, 128)

    # ---- wrapper-side layout prep (cheap XLA glue, fused by XLA) ----
    lf = lfeats.astype(jnp.float32)
    df = dif_lfeats.astype(jnp.float32)
    ones = jnp.ones((B, 1), jnp.float32)
    zeros = jnp.zeros((B, 1), jnp.float32)
    x = jnp.concatenate([lf, df, ones, zeros], axis=1)                # (B, 32)

    w = jnp.zeros((K_PAD, J_pad), jnp.float32)
    w = w.at[:D_L + D_D, :J].set(W.astype(jnp.float32))
    w = w.at[D_L + D_D, :J].set(b.reshape(-1).astype(jnp.float32))    # folded bias row

    # ---- batch tiling: sublane-aligned block, pad B up, never fall back ----
    # Keep per-step footprint ~ 2*bb*(K_PAD + J_pad)*4 B (double-buffered
    # in+out) well under the smallest scoped-VMEM default (16 MiB on v5e).
    budget_bytes = 12 * 1024 * 1024
    max_bb = max(8, budget_bytes // (8 * (K_PAD + J_pad)))
    bb = max(8, min(block_b, max_bb))
    bb = (bb // 8) * 8
    bb = min(bb, _round_up(B, 8))         # don't tile bigger than the batch
    B_pad = _round_up(B, bb)
    if B_pad != B:
        x = jnp.pad(x, ((0, B_pad - B), (0, 0)))

    out = pl.pallas_call(
        location_encoder_kernel,
        grid=(B_pad // bb,),
        in_specs=[
            pl.BlockSpec((bb, K_PAD), lambda i: (i, 0)),
            pl.BlockSpec((K_PAD, J_pad), lambda i: (0, 0)),
        ],
        out_specs=pl.BlockSpec((bb, J_pad), lambda i: (i, 0)),
        out_shape=jax.ShapeDtypeStruct((B_pad, J_pad), jnp.float32),
        compiler_params=pltpu.CompilerParams(
            dimension_semantics=("parallel",)),
    )(x, w)

    return out[:B, :J]


def reference_forward(lfeats, dif_lfeats, params):
    """Pure-JAX mirror of the PyTorch forward for verification."""
    def norm(v):
        n = jnp.linalg.norm(v, axis=1, keepdims=True)
        return v / jnp.maximum(n, EPS)

    concat = jnp.concatenate([norm(lfeats), norm(dif_lfeats)], axis=1)   # (B, 30)
    return concat @ params['W'] + params['b'][None, :]                   # (B, J)


def make_params(key, jemb):
    k1, k2 = jax.random.split(key, 2)
    return {
        # torch fc.weight is (J, 30); store transposed as (30, J).
        'W': 0.1 * jax.random.normal(k1, (D_L + D_D, jemb), dtype=jnp.float32),
        'b': 0.1 * jax.random.normal(k2, (jemb,), dtype=jnp.float32),
    }


if __name__ == "__main__":
    key = jax.random.PRNGKey(0)
    k_p, k_lf, k_df, k_lf2, k_df2 = jax.random.split(key, 5)

    # Small shapes consistent with the module: batch=2, jemb_dim=32.
    B, JEMB = 2, 32
    params = make_params(k_p, JEMB)
    lfeats = jax.random.normal(k_lf, (B, D_L), dtype=jnp.float32)
    dif_lfeats = jax.random.normal(k_df, (B, D_D), dtype=jnp.float32)

    out = location_encoder_forward(lfeats, dif_lfeats, params)
    jax.block_until_ready(out)
    ref = reference_forward(lfeats, dif_lfeats, params)
    assert out.shape == (B, JEMB)
    assert jnp.allclose(out, ref, atol=1e-4, rtol=1e-3), float(jnp.max(jnp.abs(out - ref)))

    # Uneven batch: exercises batch padding + multi-step parallel grid.
    B2 = 67
    lf2 = jax.random.normal(k_lf2, (B2, D_L), dtype=jnp.float32)
    df2 = jax.random.normal(k_df2, (B2, D_D), dtype=jnp.float32)
    out2 = location_encoder_forward(lf2, df2, params, block_b=16)
    jax.block_until_ready(out2)
    ref2 = reference_forward(lf2, df2, params)
    assert out2.shape == (B2, JEMB)
    assert jnp.allclose(out2, ref2, atol=1e-4, rtol=1e-3), float(jnp.max(jnp.abs(out2 - ref2)))

    print("KERNEL_OK")
</pallas_src>

<mosaic_0001>
module attributes {stable_mosaic.version = 11 : i64} {
  func.func @location_encoder_kernel(%arg0: i32, %arg1: memref<8x32xf32, #tpu.memory_space<vmem>>, %arg2: memref<32x128xf32, #tpu.memory_space<vmem>>, %arg3: memref<8x128xf32, #tpu.memory_space<vmem>>) attributes {dimension_semantics = [#tpu.dimension_semantics<parallel>], iteration_bounds = array<i64: 1>, scalar_prefetch = 0 : i64, scratch_operands = 0 : i64, tpu.core_type = #tpu.core_type<tc>, window_params = [{transform_indices = @transform_0, window_bounds = array<i64: 8, 32>}, {pipeline_mode = #tpu.pipeline_mode<synchronous>, transform_indices = @transform_1, window_bounds = array<i64: 32, 128>}, {transform_indices = @transform_2, window_bounds = array<i64: 8, 128>}]} {
    %c0 = arith.constant 0 : index
    %c0_0 = arith.constant 0 : index
    %0 = vector.load %arg1[%c0, %c0_0] : memref<8x32xf32, #tpu.memory_space<vmem>>, vector<8x32xf32>
    %1 = tpu.iota {dimensions = array<i32: 1>} : vector<8x32xi32>
    %c5_i32 = arith.constant 5 : i32
    %2 = vector.broadcast %c5_i32 : i32 to vector<8x32xi32>
    %3 = arith.cmpi slt, %1, %2 : vector<8x32xi32>
    %c5_i32_1 = arith.constant 5 : i32
    %4 = vector.broadcast %c5_i32_1 : i32 to vector<8x32xi32>
    %5 = arith.cmpi sge, %1, %4 : vector<8x32xi32>
    %c30_i32 = arith.constant 30 : i32
    %6 = vector.broadcast %c30_i32 : i32 to vector<8x32xi32>
    %7 = arith.cmpi slt, %1, %6 : vector<8x32xi32>
    %8 = arith.andi %5, %7 : vector<8x32xi1>
    %9 = arith.mulf %0, %0 : vector<8x32xf32>
    %cst = arith.constant 0.000000e+00 : f32
    %10 = vector.broadcast %cst : f32 to vector<8x32xf32>
    %11 = arith.select %3, %9, %10 : vector<8x32xi1>, vector<8x32xf32>
    %cst_2 = arith.constant dense<0.000000e+00> : vector<8xf32>
    %12 = vector.multi_reduction <add>, %11, %cst_2 [1] : vector<8x32xf32> to vector<8xf32>
    %13 = vector.shape_cast %12 : vector<8xf32> to vector<8x1xf32>
    %cst_3 = arith.constant 0.000000e+00 : f32
    %14 = vector.broadcast %cst_3 : f32 to vector<8x32xf32>
    %15 = arith.select %8, %9, %14 : vector<8x32xi1>, vector<8x32xf32>
    %cst_4 = arith.constant dense<0.000000e+00> : vector<8xf32>
    %16 = vector.multi_reduction <add>, %15, %cst_4 [1] : vector<8x32xf32> to vector<8xf32>
    %17 = vector.shape_cast %16 : vector<8xf32> to vector<8x1xf32>
    %cst_5 = arith.constant 1.000000e-24 : f32
    %18 = vector.broadcast %cst_5 : f32 to vector<8x1xf32>
    %19 = arith.maximumf %13, %18 : vector<8x1xf32>
    %20 = math.rsqrt %19 : vector<8x1xf32>
    %cst_6 = arith.constant 1.000000e-24 : f32
    %21 = vector.broadcast %cst_6 : f32 to vector<8x1xf32>
    %22 = arith.maximumf %17, %21 : vector<8x1xf32>
    %23 = math.rsqrt %22 : vector<8x1xf32>
    %cst_7 = arith.constant 1.000000e+00 : f32
    %24 = vector.shape_cast %23 : vector<8x1xf32> to vector<8x1xf32>
    %25 = vector.broadcast %24 : vector<8x1xf32> to vector<8x32xf32>
    %26 = vector.broadcast %cst_7 : f32 to vector<8x32xf32>
    %27 = arith.select %8, %25, %26 : vector<8x32xi1>, vector<8x32xf32>
    %28 = vector.shape_cast %20 : vector<8x1xf32> to vector<8x1xf32>
    %29 = vector.broadcast %28 : vector<8x1xf32> to vector<8x32xf32>
    %30 = arith.select %3, %29, %27 : vector<8x32xi1>, vector<8x32xf32>
    %31 = arith.mulf %0, %30 : vector<8x32xf32>
    %c0_8 = arith.constant 0 : index
    %c0_9 = arith.constant 0 : index
    %32 = vector.load %arg2[%c0_8, %c0_9] : memref<32x128xf32, #tpu.memory_space<vmem>>, vector<32x128xf32>
    %cst_10 = arith.constant dense<0.000000e+00> : vector<8x128xf32>
    %33 = tpu.matmul %31, %32, %cst_10 {dimension_numbers = #tpu.dot_dimension_numbers<[1], [0], [0], [1], [0, 0, 1, 1], [], []>} : vector<8x32xf32>, vector<32x128xf32>, vector<8x128xf32> -> vector<8x128xf32>
    %c0_11 = arith.constant 0 : index
    %c0_12 = arith.constant 0 : index
    %34 = vector.load %arg3[%c0_11, %c0_12] : memref<8x128xf32, #tpu.memory_space<vmem>>, vector<8x128xf32>
    tpu.vector_store %arg3[%c0_11, %c0_12], %33 {strides = array<i32>} : memref<8x128xf32, #tpu.memory_space<vmem>>, vector<8x128xf32>,
    return
  }
  func.func @transform_0(%arg0: i32) -> (i32, i32) {
    %c0_i32 = arith.constant 0 : i32
    %c0_i32_0 = arith.constant 0 : i32
    return %arg0, %c0_i32 : i32, i32
  }
  func.func @transform_1(%arg0: i32) -> (i32, i32) {
    %c0_i32 = arith.constant 0 : i32
    %c0_i32_0 = arith.constant 0 : i32
    %c0_i32_1 = arith.constant 0 : i32
    return %c0_i32, %c0_i32_0 : i32, i32
  }
  func.func @transform_2(%arg0: i32) -> (i32, i32) {
    %c0_i32 = arith.constant 0 : i32
    %c0_i32_0 = arith.constant 0 : i32
    return %arg0, %c0_i32 : i32, i32
  }
}

</mosaic_0001>

<bundles_post_ra>
// kernel: location_encoder_forward.1
= control target key start
LH: loop header
LB: loop body
LE: loop exit
PB: predicated region body
PF: predicated region fallthrough
CT: control target
= control target key end

     0   :  { %v12_v0 = vlaneseq  ;;  %vm20_vm2 = vcmask 261120   ;;  %v140_v9 = vmov 0.0   ;;  %vm141_vm5 = vmmov 0   ;;  %s188_s0 = inlined_call_operand.vmem [shape: f32[8,32], index: 0, kind: input, shape index: {}]   ;;  %s189_s1 = inlined_call_operand.vmem [shape: f32[32,128], index: 1, kind: input, shape index: {}]   ;;  %s190_s2 = inlined_call_operand.vmem [shape: f32[8,128], index: 2, kind: output, shape index: {}]  }
   0x1   :  { %v11_v1 = vld [vmem:[%s188_s0] sm:$0xff]  ;;  %123 = vmatprep.subr.mxu0 %v140_v9  ;;  %v38_v10 = vld [vmem:[%s189_s1 + $0x18] sm:$0xff]  ;;  %v37_v11 = vld [vmem:[%s189_s1 + $0x10] sm:$0xff]  ;;  %131 = vmatprep.mubr.msk.f32.mxu0 %vm141_vm5, %v140_v9 }
   0x2   :  { %v13_v2 = vand.u32 127, %v12_v0  ;;  %v18_v3 = vmul.f32 %v11_v1, %v11_v1  ;;  %124 = vmatpush3.msra.mxu0 %v38_v10  ;;  %v36_v12 = vld [vmem:[%s189_s1 + $0x8] sm:$0xff]  ;;  %v35_v13 = vld [vmem:[%s189_s1] sm:$0xff] }
   0x3   :  { %125 = vmatprep.subr.mxu0 %v140_v9 }
   0x4   :  { %vm15_vm0 = vcmp.ge.s32.totalorder %v13_v2, 5  ;;  %vm16_vm1 = vcmp.lt.s32.totalorder %v13_v2, 30  ;;  %vm14_vm3 = vcmp.lt.s32.totalorder %v13_v2, 5  ;;  %126 = vmatpush3.msra.mxu0 %v37_v11 }
   0x5   :  { %vm160_vm4 = vmand %vm15_vm0, %vm16_vm1  ;;  %v19_v6 = vsel %vm14_vm3, %v18_v3, 0.0  ;;  %127 = vmatprep.subr.mxu0 %v140_v9 }
   0x6   :  { %v24_v5 = vsel %vm160_vm4, %v18_v3, 0.0  ;;  %v21_v8 = vsel %vm20_vm2, %v19_v6, 0.0  ;;  %128 = vmatpush3.msra.mxu0 %v36_v12 }
   0x7   :  { %v25_v7 = vsel %vm20_vm2, %v24_v5, 0.0  ;;  %129 = vmatprep.subr.mxu0 %v140_v9 }
   0x8   :  { %26 = vadd.xlane.f32.xlu0 %v25_v7  ;;  %130 = vmatpush3.msra.mxu0 %v35_v13 }
   0xc   :  { %22 = vadd.xlane.f32.xlu0 %v21_v8 }
  0x91   :  { %v27_v14 = vpop.xlane.xlu0 %26 }
  0x92   :  { %v30_v15 = vmax.f32 %v27_v14, 1e-24 }
  0x94   :  { %136 = vrsqrt.f32 %v30_v15 }
  0x95   :  { %v23_v16 = vpop.xlane.xlu0 %22 }
  0x96   :  { %v28_v17 = vmax.f32 %v23_v16, 1e-24 }
  0x98   :  { %138 = vrsqrt.f32 %v28_v17 }
  0xa1   :  { %v137_v18 = vpop.eup %136 }
  0xa2   :  { %v32_v20 = vsel %vm160_vm4, %v137_v18, 1.0 }
  0xa5   :  { %v139_v19 = vpop.eup %138 }
  0xa6   :  { %v33_v21 = vsel %vm14_vm3, %v139_v19, %v32_v20 }
  0xa7   :  { %v34_v22 = vmul.f32 %v33_v21, %v11_v1 }
  0xa9   :  { %132 = vmatmul.mubr.msk.f32.vlgmr.msra.gmra.mxu0 %vm20_vm2, %v34_v22 }
 0x169   :  { %v108_v23 = vpop.f32.mrf.mxu0 }
 0x16a   :  { %112 = vst [vmem:[%s190_s2] sm:$0xff] %v108_v23 }
 0x16b   :  { %v133_v24 = vpop.f32.mrf.mxu0 }

</bundles_post_ra>
